<compile_context>
chip_gen: v5e
topology: v5e:2x2
jax: 0.10.0
libtpu: 0.0.40
codegen_flags: <defaults>
</compile_context>

<pallas_src>
import jax
import jax.numpy as jnp
from jax.experimental import pallas as pl
from jax.experimental.pallas import tpu as pltpu

IN_DIM = 32
HIDDEN = 256
OUT_DIM = 1
OUT_PAD = 128          # lane-dense padded width of the final layer


def _round_up(a, m):
    return ((a + m - 1) // m) * m


def mlp_kernel(x_ref, w1_ref, b1_ref, w2_ref, b2_ref,
               w3_ref, b3_ref, w4_ref, b4_ref, o_ref):
    # Layer 1: Linear + ReLU   (Dropout = identity in eval mode)
    h = jnp.dot(x_ref[...], w1_ref[...], preferred_element_type=jnp.float32)
    h = jnp.maximum(h + b1_ref[...], 0.0)
    # Layer 2: Linear + ReLU
    h = jnp.dot(h.astype(w2_ref.dtype), w2_ref[...],
                preferred_element_type=jnp.float32)
    h = jnp.maximum(h + b2_ref[...], 0.0)
    # Layer 3: Linear + ReLU
    h = jnp.dot(h.astype(w3_ref.dtype), w3_ref[...],
                preferred_element_type=jnp.float32)
    h = jnp.maximum(h + b3_ref[...], 0.0)
    # Layer 4: Linear (logits), padded to 128 lane-dense output columns
    o_ref[...] = jnp.dot(h.astype(w4_ref.dtype), w4_ref[...],
                         preferred_element_type=jnp.float32) + b4_ref[...]


def neural_network_forward(x, params, *, tb=512, use_bf16=True):
    """x: (B, ...) -> flattened to (B, in_dim). Returns logits (B, 1) f32."""
    B = x.shape[0]
    x = x.reshape(B, -1)              # nn.Flatten
    in_dim = x.shape[1]
    (w1, b1, w2, b2, w3, b3, w4, b4) = params

    # Pad the final layer to OUT_PAD zero columns -> lane-dense (tb,128) stores
    # and a full-width N=128 MXU matmul.  Only column 0 is returned.
    w4p = jnp.zeros((HIDDEN, OUT_PAD), w4.dtype).at[:, :OUT_DIM].set(w4)
    b4p = jnp.zeros((1, OUT_PAD), b4.dtype).at[:, :OUT_DIM].set(b4)

    # bf16 MXU operands (weights + activations); biases / accumulation stay f32.
    op_dtype = jnp.bfloat16 if use_bf16 else jnp.float32
    xk = x.astype(op_dtype)
    w1k, w2k, w3k, w4k = (w.astype(op_dtype) for w in (w1, w2, w3, w4p))

    # Batch tiling: big tiles for MXU fill, clamped for small batches; pad the
    # tail tile with zeros so any B works (padded rows are dropped afterwards).
    tb_eff = max(8, min(_round_up(tb, 8), _round_up(B, 8)))
    n_tiles = pl.cdiv(B, tb_eff)
    B_pad = n_tiles * tb_eff
    if B_pad != B:
        xk = jnp.pad(xk, ((0, B_pad - B), (0, 0)))

    # Weights/biases: constant index_map -> block stays resident across steps.
    def weight_spec(shape):
        return pl.BlockSpec(shape, lambda i: (0, 0))

    out = pl.pallas_call(
        mlp_kernel,
        out_shape=jax.ShapeDtypeStruct((B_pad, OUT_PAD), jnp.float32),
        grid_spec=pltpu.PrefetchScalarGridSpec(
            num_scalar_prefetch=0,
            grid=(n_tiles,),
            in_specs=[
                pl.BlockSpec((tb_eff, in_dim), lambda i: (i, 0)),  # x tile
                weight_spec((in_dim, HIDDEN)),                     # w1
                weight_spec((1, HIDDEN)),                          # b1
                weight_spec((HIDDEN, HIDDEN)),                     # w2
                weight_spec((1, HIDDEN)),                          # b2
                weight_spec((HIDDEN, HIDDEN)),                     # w3
                weight_spec((1, HIDDEN)),                          # b3
                weight_spec((HIDDEN, OUT_PAD)),                    # w4 (padded)
                weight_spec((1, OUT_PAD)),                         # b4 (padded)
            ],
            out_specs=pl.BlockSpec((tb_eff, OUT_PAD), lambda i: (i, 0)),
        ),
        compiler_params=pltpu.CompilerParams(
            dimension_semantics=("parallel",),
            vmem_limit_bytes=64 * 1024 * 1024,
        ),
    )(xk, w1k, b1, w2k, b2, w3k, b3, w4k, b4p)

    return out[:B, :OUT_DIM]


def init_params(key, in_dim):
    """Deterministic init matching the PyTorch layer shapes (stored transposed)."""
    ks = jax.random.split(key, 8)

    def lin(kw, kb, fan_in, fan_out):
        bound = 1.0 / jnp.sqrt(fan_in)
        w = jax.random.uniform(kw, (fan_in, fan_out), jnp.float32, -bound, bound)
        b = jax.random.uniform(kb, (1, fan_out), jnp.float32, -bound, bound)
        return w, b

    w1, b1 = lin(ks[0], ks[1], in_dim, HIDDEN)
    w2, b2 = lin(ks[2], ks[3], HIDDEN, HIDDEN)
    w3, b3 = lin(ks[4], ks[5], HIDDEN, HIDDEN)
    w4, b4 = lin(ks[6], ks[7], HIDDEN, OUT_DIM)
    return (w1, b1, w2, b2, w3, b3, w4, b4)


def reference_forward(x, params, *, op_dtype=jnp.float32):
    """Pure-JAX reference with matching operand dtype and f32 accumulation."""
    (w1, b1, w2, b2, w3, b3, w4, b4) = params

    def lin(h, w, b):
        return jnp.dot(h.astype(op_dtype), w.astype(op_dtype),
                       preferred_element_type=jnp.float32) + b

    h = x.reshape(x.shape[0], -1)
    h = jnp.maximum(lin(h, w1, b1), 0.0)
    h = jnp.maximum(lin(h, w2, b2), 0.0)
    h = jnp.maximum(lin(h, w3, b3), 0.0)
    return lin(h, w4, b4)


if __name__ == "__main__":
    key = jax.random.PRNGKey(0)
    kx, kp = jax.random.split(key)
    B = 16
    x = jax.random.normal(kx, (B, IN_DIM), jnp.float32)
    params = init_params(kp, IN_DIM)

    # bf16-operand path (default, fast on v6e/v7x)
    logits = neural_network_forward(x, params)
    jax.block_until_ready(logits)
    assert logits.shape == (B, OUT_DIM)
    ref_bf16 = reference_forward(x, params, op_dtype=jnp.bfloat16)
    assert jnp.allclose(logits, ref_bf16, atol=2e-2, rtol=2e-2)

    # strict f32-operand path
    logits_f32 = neural_network_forward(x, params, use_bf16=False)
    jax.block_until_ready(logits_f32)
    ref_f32 = reference_forward(x, params, op_dtype=jnp.float32)
    assert logits_f32.shape == (B, OUT_DIM)
    assert jnp.allclose(logits_f32, ref_f32, atol=2e-3, rtol=2e-3)

    print("KERNEL_OK")
</pallas_src>

<mosaic_0001>
module attributes {stable_mosaic.version = 11 : i64} {
  func.func @mlp_kernel(%arg0: i32, %arg1: memref<16x32xbf16, #tpu.memory_space<vmem>>, %arg2: memref<32x256xbf16, #tpu.memory_space<vmem>>, %arg3: memref<1x256xf32, #tpu.memory_space<vmem>>, %arg4: memref<256x256xbf16, #tpu.memory_space<vmem>>, %arg5: memref<1x256xf32, #tpu.memory_space<vmem>>, %arg6: memref<256x256xbf16, #tpu.memory_space<vmem>>, %arg7: memref<1x256xf32, #tpu.memory_space<vmem>>, %arg8: memref<256x128xbf16, #tpu.memory_space<vmem>>, %arg9: memref<1x128xf32, #tpu.memory_space<vmem>>, %arg10: memref<16x128xf32, #tpu.memory_space<vmem>>) attributes {dimension_semantics = [#tpu.dimension_semantics<parallel>], iteration_bounds = array<i64: 1>, scalar_prefetch = 0 : i64, scratch_operands = 0 : i64, tpu.core_type = #tpu.core_type<tc>, window_params = [{transform_indices = @transform_0, window_bounds = array<i64: 16, 32>}, {pipeline_mode = #tpu.pipeline_mode<synchronous>, transform_indices = @transform_1, window_bounds = array<i64: 32, 256>}, {pipeline_mode = #tpu.pipeline_mode<synchronous>, transform_indices = @transform_2, window_bounds = array<i64: 1, 256>}, {pipeline_mode = #tpu.pipeline_mode<synchronous>, transform_indices = @transform_3, window_bounds = array<i64: 256, 256>}, {pipeline_mode = #tpu.pipeline_mode<synchronous>, transform_indices = @transform_4, window_bounds = array<i64: 1, 256>}, {pipeline_mode = #tpu.pipeline_mode<synchronous>, transform_indices = @transform_5, window_bounds = array<i64: 256, 256>}, {pipeline_mode = #tpu.pipeline_mode<synchronous>, transform_indices = @transform_6, window_bounds = array<i64: 1, 256>}, {pipeline_mode = #tpu.pipeline_mode<synchronous>, transform_indices = @transform_7, window_bounds = array<i64: 256, 128>}, {pipeline_mode = #tpu.pipeline_mode<synchronous>, transform_indices = @transform_8, window_bounds = array<i64: 1, 128>}, {transform_indices = @transform_9, window_bounds = array<i64: 16, 128>}]} {
    %c0 = arith.constant 0 : index
    %c0_0 = arith.constant 0 : index
    %0 = vector.load %arg1[%c0, %c0_0] : memref<16x32xbf16, #tpu.memory_space<vmem>>, vector<16x32xbf16>
    %c0_1 = arith.constant 0 : index
    %c0_2 = arith.constant 0 : index
    %1 = vector.load %arg2[%c0_1, %c0_2] : memref<32x256xbf16, #tpu.memory_space<vmem>>, vector<32x256xbf16>
    %cst = arith.constant dense<0.000000e+00> : vector<16x256xf32>
    %2 = tpu.matmul %0, %1, %cst {dimension_numbers = #tpu.dot_dimension_numbers<[1], [0], [0], [1], [0, 0, 1, 1], [], []>} : vector<16x32xbf16>, vector<32x256xbf16>, vector<16x256xf32> -> vector<16x256xf32>
    %c0_3 = arith.constant 0 : index
    %c0_4 = arith.constant 0 : index
    %3 = vector.load %arg3[%c0_3, %c0_4] : memref<1x256xf32, #tpu.memory_space<vmem>>, vector<1x256xf32>
    %4 = vector.broadcast %3 : vector<1x256xf32> to vector<16x256xf32>
    %5 = arith.addf %2, %4 : vector<16x256xf32>
    %cst_5 = arith.constant 0.000000e+00 : f32
    %6 = vector.broadcast %cst_5 : f32 to vector<16x256xf32>
    %7 = arith.maximumf %5, %6 : vector<16x256xf32>
    %8 = arith.truncf %7 : vector<16x256xf32> to vector<16x256xbf16>
    %c0_6 = arith.constant 0 : index
    %c0_7 = arith.constant 0 : index
    %9 = vector.load %arg4[%c0_6, %c0_7] : memref<256x256xbf16, #tpu.memory_space<vmem>>, vector<256x256xbf16>
    %cst_8 = arith.constant dense<0.000000e+00> : vector<16x256xf32>
    %10 = tpu.matmul %8, %9, %cst_8 {dimension_numbers = #tpu.dot_dimension_numbers<[1], [0], [0], [1], [0, 0, 1, 1], [], []>} : vector<16x256xbf16>, vector<256x256xbf16>, vector<16x256xf32> -> vector<16x256xf32>
    %c0_9 = arith.constant 0 : index
    %c0_10 = arith.constant 0 : index
    %11 = vector.load %arg5[%c0_9, %c0_10] : memref<1x256xf32, #tpu.memory_space<vmem>>, vector<1x256xf32>
    %12 = vector.broadcast %11 : vector<1x256xf32> to vector<16x256xf32>
    %13 = arith.addf %10, %12 : vector<16x256xf32>
    %cst_11 = arith.constant 0.000000e+00 : f32
    %14 = vector.broadcast %cst_11 : f32 to vector<16x256xf32>
    %15 = arith.maximumf %13, %14 : vector<16x256xf32>
    %16 = arith.truncf %15 : vector<16x256xf32> to vector<16x256xbf16>
    %c0_12 = arith.constant 0 : index
    %c0_13 = arith.constant 0 : index
    %17 = vector.load %arg6[%c0_12, %c0_13] : memref<256x256xbf16, #tpu.memory_space<vmem>>, vector<256x256xbf16>
    %cst_14 = arith.constant dense<0.000000e+00> : vector<16x256xf32>
    %18 = tpu.matmul %16, %17, %cst_14 {dimension_numbers = #tpu.dot_dimension_numbers<[1], [0], [0], [1], [0, 0, 1, 1], [], []>} : vector<16x256xbf16>, vector<256x256xbf16>, vector<16x256xf32> -> vector<16x256xf32>
    %c0_15 = arith.constant 0 : index
    %c0_16 = arith.constant 0 : index
    %19 = vector.load %arg7[%c0_15, %c0_16] : memref<1x256xf32, #tpu.memory_space<vmem>>, vector<1x256xf32>
    %20 = vector.broadcast %19 : vector<1x256xf32> to vector<16x256xf32>
    %21 = arith.addf %18, %20 : vector<16x256xf32>
    %cst_17 = arith.constant 0.000000e+00 : f32
    %22 = vector.broadcast %cst_17 : f32 to vector<16x256xf32>
    %23 = arith.maximumf %21, %22 : vector<16x256xf32>
    %24 = arith.truncf %23 : vector<16x256xf32> to vector<16x256xbf16>
    %c0_18 = arith.constant 0 : index
    %c0_19 = arith.constant 0 : index
    %25 = vector.load %arg8[%c0_18, %c0_19] : memref<256x128xbf16, #tpu.memory_space<vmem>>, vector<256x128xbf16>
    %cst_20 = arith.constant dense<0.000000e+00> : vector<16x128xf32>
    %26 = tpu.matmul %24, %25, %cst_20 {dimension_numbers = #tpu.dot_dimension_numbers<[1], [0], [0], [1], [0, 0, 1, 1], [], []>} : vector<16x256xbf16>, vector<256x128xbf16>, vector<16x128xf32> -> vector<16x128xf32>
    %c0_21 = arith.constant 0 : index
    %c0_22 = arith.constant 0 : index
    %27 = vector.load %arg9[%c0_21, %c0_22] : memref<1x128xf32, #tpu.memory_space<vmem>>, vector<1x128xf32>
    %28 = vector.broadcast %27 : vector<1x128xf32> to vector<16x128xf32>
    %29 = arith.addf %26, %28 : vector<16x128xf32>
    %c0_23 = arith.constant 0 : index
    %c0_24 = arith.constant 0 : index
    %30 = vector.load %arg10[%c0_23, %c0_24] : memref<16x128xf32, #tpu.memory_space<vmem>>, vector<16x128xf32>
    tpu.vector_store %arg10[%c0_23, %c0_24], %29 {strides = array<i32>} : memref<16x128xf32, #tpu.memory_space<vmem>>, vector<16x128xf32>,
    return
  }
  func.func @transform_0(%arg0: i32) -> (i32, i32) {
    %c0_i32 = arith.constant 0 : i32
    %c0_i32_0 = arith.constant 0 : i32
    return %arg0, %c0_i32 : i32, i32
  }
  func.func @transform_1(%arg0: i32) -> (i32, i32) {
    %c0_i32 = arith.constant 0 : i32
    %c0_i32_0 = arith.constant 0 : i32
    %c0_i32_1 = arith.constant 0 : i32
    return %c0_i32, %c0_i32_0 : i32, i32
  }
  func.func @transform_2(%arg0: i32) -> (i32, i32) {
    %c0_i32 = arith.constant 0 : i32
    %c0_i32_0 = arith.constant 0 : i32
    %c0_i32_1 = arith.constant 0 : i32
    return %c0_i32, %c0_i32_0 : i32, i32
  }
  func.func @transform_3(%arg0: i32) -> (i32, i32) {
    %c0_i32 = arith.constant 0 : i32
    %c0_i32_0 = arith.constant 0 : i32
    %c0_i32_1 = arith.constant 0 : i32
    return %c0_i32, %c0_i32_0 : i32, i32
  }
  func.func @transform_4(%arg0: i32) -> (i32, i32) {
    %c0_i32 = arith.constant 0 : i32
    %c0_i32_0 = arith.constant 0 : i32
    %c0_i32_1 = arith.constant 0 : i32
    return %c0_i32, %c0_i32_0 : i32, i32
  }
  func.func @transform_5(%arg0: i32) -> (i32, i32) {
    %c0_i32 = arith.constant 0 : i32
    %c0_i32_0 = arith.constant 0 : i32
    %c0_i32_1 = arith.constant 0 : i32
    return %c0_i32, %c0_i32_0 : i32, i32
  }
  func.func @transform_6(%arg0: i32) -> (i32, i32) {
    %c0_i32 = arith.constant 0 : i32
    %c0_i32_0 = arith.constant 0 : i32
    %c0_i32_1 = arith.constant 0 : i32
    return %c0_i32, %c0_i32_0 : i32, i32
  }
  func.func @transform_7(%arg0: i32) -> (i32, i32) {
    %c0_i32 = arith.constant 0 : i32
    %c0_i32_0 = arith.constant 0 : i32
    %c0_i32_1 = arith.constant 0 : i32
    return %c0_i32, %c0_i32_0 : i32, i32
  }
  func.func @transform_8(%arg0: i32) -> (i32, i32) {
    %c0_i32 = arith.constant 0 : i32
    %c0_i32_0 = arith.constant 0 : i32
    %c0_i32_1 = arith.constant 0 : i32
    return %c0_i32, %c0_i32_0 : i32, i32
  }
  func.func @transform_9(%arg0: i32) -> (i32, i32) {
    %c0_i32 = arith.constant 0 : i32
    %c0_i32_0 = arith.constant 0 : i32
    return %arg0, %c0_i32 : i32, i32
  }
}

</mosaic_0001>

<bundles_post_ra>
// kernel: tpu_custom_call.1
= control target key start
LH: loop header
LB: loop body
LE: loop exit
PB: predicated region body
PF: predicated region fallthrough
CT: control target
= control target key end

     0   :  { %14 = vsyncpa [#allocation3], 0  ;;  %s1627_s0 = inlined_call_operand.hbm [shape: bf16[16,32], index: 0, kind: input, shape index: {}]   ;;  %s1628_s1 = inlined_call_operand.hbm [shape: bf16[32,256], index: 1, kind: input, shape index: {}]   ;;  %s1629_s2 = inlined_call_operand.hbm [shape: f32[1,256], index: 2, kind: input, shape index: {}]   ;;  %s1630_s3 = inlined_call_operand.hbm [shape: bf16[256,256], index: 3, kind: input, shape index: {}]   ;;  %s1631_s4 = inlined_call_operand.vmem [shape: f32[1,256], index: 4, kind: input, shape index: {}]   ;;  %s1632_s5 = inlined_call_operand.hbm [shape: bf16[256,256], index: 5, kind: input, shape index: {}]   ;;  %s1633_s6 = inlined_call_operand.vmem [shape: f32[1,256], index: 6, kind: input, shape index: {}]   ;;  %s1634_s7 = inlined_call_operand.hbm [shape: bf16[256,128], index: 7, kind: input, shape index: {}]   ;;  %s1635_s8 = inlined_call_operand.vmem [shape: f32[1,128], index: 8, kind: input, shape index: {}]   ;;  %s1636_s9 = inlined_call_operand.hbm [shape: f32[16,128], index: 9, kind: output, shape index: {}]  }
   0x1   :  { %15 = vsyncpa [#allocation6], 0 }
   0x2   :  { %16 = vsyncpa [#allocation9], 0 }
   0x3   :  { %17 = vsyncpa [#allocation12], 0  ;;  %s36_s11 = sshll.u32 %s1628_s1, 4  ;;  %s37_s11 = int_to_ptr.hbm [resolvable:$true] %s36_s11 }
   0x4   :  { %18 = vsyncpa [#allocation4], 0  ;;  %s1522_s12 = smov [#allocation5]   ;;  %s60_s16 = sshll.u32 %s1630_s3, 4  ;;  %s61_s16 = int_to_ptr.hbm [resolvable:$true] %s60_s16 }
   0x5   :  { %s38_s13 = sshll.u32 %s1522_s12, 4  ;;  %s1523_s17 = smov 128   ;;  %s39_s13 = int_to_ptr.vmem [resolvable:$true] %s38_s13 }
   0x6   :  { %s1524_s18 = smov 8   ;;  %s1525_s19 = smov [#allocation8]  }
   0x7   :  { %44 = dma.hbm_to_vmem [thread:$0]  %s37_s11, 512, %s39_s13, [#allocation6], %s1523_s17, %s1523_s17, %s1524_s18  }
   0x8   :  { %s62_s20 = sshll.u32 %s1525_s19, 4  ;;  %s23_s22 = sshll.u32 %s1627_s0, 4  ;;  %s63_s20 = int_to_ptr.vmem [resolvable:$true] %s62_s20  ;;  %s24_s22 = int_to_ptr.hbm [resolvable:$true] %s23_s22 }
   0x9   :  { %68 = dma.hbm_to_vmem [thread:$0]  %s61_s16, 4096, %s63_s20, [#allocation9], %s1523_s17, %s1523_s17, %s1524_s18  }
   0xa   :  { %s1526_s3 = smov [#allocation2]   ;;  %s50_s26 = sshll.u32 %s1629_s2, 4  ;;  %s51_s26 = int_to_ptr.hbm [resolvable:$true] %s50_s26 }
   0xb   :  { %s25_s23 = sshll.u32 %s1526_s3, 4  ;;  %s1527_s27 = smov 64   ;;  %s26_s23 = int_to_ptr.vmem [resolvable:$true] %s25_s23 }
   0xc   :  { %s1528_s28 = smov 4   ;;  %s1529_s29 = smov [#allocation7]  }
   0xd   :  { %31 = dma.hbm_to_vmem [thread:$0]  %s24_s22, 128, %s26_s23, [#allocation3], %s1527_s27, %s1527_s27, %s1528_s28  }
   0xe   :  { %s52_s30 = sshll.u32 %s1529_s29, 4  ;;  %s75_s11 = sshll.u32 %s1632_s5, 4  ;;  %s53_s30 = int_to_ptr.vmem [resolvable:$true] %s52_s30  ;;  %s76_s11 = int_to_ptr.hbm [resolvable:$true] %s75_s11 }
   0xf   :  { %55 = dma.hbm_to_vmem [thread:$0]  %s51_s26, 32, %s53_s30, [#allocation6]  }
  0x10   :  { %s90_s14 = sshll.u32 %s1634_s7, 4  ;;  %s1530_s15 = smov [#allocation10]   ;;  %s91_s14 = int_to_ptr.hbm [resolvable:$true] %s90_s14 }
  0x11   :  { %s77_s16 = sshll.u32 %s1530_s15, 4  ;;  %s1531_s2 = smov [#allocation11]   ;;  %s78_s16 = int_to_ptr.vmem [resolvable:$true] %s77_s16 }
  0x12   :  { %83 = dma.hbm_to_vmem [thread:$0]  %s76_s11, 4096, %s78_s16, [#allocation9], %s1523_s17, %s1523_s17, %s1524_s18  }
  0x13   :  { %s92_s19 = sshll.u32 %s1531_s2, 4  ;;  %s93_s19 = int_to_ptr.vmem [resolvable:$true] %s92_s19 }
  0x14   :  { %98 = dma.hbm_to_vmem [thread:$0]  %s91_s14, 2048, %s93_s19, [#allocation12], %s1527_s27, %s1527_s27, %s1528_s28  }
  0x15   :  { %1512 = dma.done.wait [#allocation3], 128  }
  0x16   :  { %1513 = vsyncadd [#allocation3], 4294967168 }
  0x17   :  { %1514 = dma.done.wait [#allocation6], 544  }
  0x18   :  { %1515 = vsyncadd [#allocation6], 4294966752 }
  0x19   :  { %1516 = dma.done.wait [#allocation9], 8192  }
  0x1a   :  { %1517 = vsyncadd [#allocation9], 4294959104 }
  0x1b   :  { %1518 = dma.done.wait [#allocation12], 2048  }
  0x1c   :  { %1519 = vsyncadd [#allocation12], 4294965248  ;;  %v919_v0 = vld [vmem:[#allocation5 + $0x10] sm:$0xf]  ;;  %v1251_v1 = vld [vmem:[#allocation5 + $0x14] sm:$0xf0] }
  0x1d   :  { %v1250_v2 = vld [vmem:[#allocation5 + $0x14] sm:$0xf]  ;;  %v920_v3 = vor.u32 %v1251_v1, %v919_v0  ;;  %v921_v4 = vld [vmem:[#allocation5 + $0x18] sm:$0xf0]  ;;  %v911_v5 = vld [vmem:[#allocation5] sm:$0xf] }
  0x1e   :  { %v1249_v6 = vld [vmem:[#allocation5 + $0x4] sm:$0xf0]  ;;  %v924_v7 = vor.u32 %v1250_v2, %v921_v4  ;;  %v1248_v8 = vld [vmem:[#allocation5 + $0x4] sm:$0xf]  ;;  %v913_v9 = vld [vmem:[#allocation5 + $0x8] sm:$0xf0] }
  0x1f   :  { %vm163_vm0 = vcmask 261120   ;;  %173 = vmatpush.bf16.msra.mxu0 %v920_v3  ;;  %v912_v10 = vor.u32 %v1249_v6, %v911_v5  ;;  %v985_v11 = vld [vmem:[#allocation8 + $0x70] sm:$0xf]  ;;  %v1267_v12 = vld [vmem:[#allocation8 + $0x74] sm:$0xf0]  ;;  %v916_v14 = vor.u32 %v1248_v8, %v913_v9  ;;  %s1532_s1 = smov [#allocation13]  }
  0x20   :  { %v1049_v13 = vld [vmem:[#allocation8 + $0xf0] sm:$0xf]  ;;  %187 = vmatpush.bf16.msra.mxu1 %v924_v7  ;;  %v1247_v15 = vld [vmem:[#allocation2] sm:$0xff]  ;;  %v986_v16 = vor.u32 %v1267_v12, %v985_v11  ;;  %v977_v24 = vld [vmem:[#allocation8 + $0x60] sm:$0xf]  ;;  %s887_s22 = sshll.u32 %s1532_s1, 4  ;;  %s888_s22 = int_to_ptr.vmem [resolvable:$true] %s887_s22 }
  0x21   :  { %v1283_v17 = vld [vmem:[#allocation8 + $0xf4] sm:$0xf0]  ;;  %v1266_v18 = vld [vmem:[#allocation8 + $0x74] sm:$0xf]  ;;  %v987_v19 = vld [vmem:[#allocation8 + $0x78] sm:$0xf0] }
  0x22   :  { %v1050_v20 = vor.u32 %v1283_v17, %v1049_v13  ;;  %v990_v21 = vor.u32 %v1266_v18, %v987_v19  ;;  %v1282_v22 = vld [vmem:[#allocation8 + $0xf4] sm:$0xf]  ;;  %v1051_v23 = vld [vmem:[#allocation8 + $0xf8] sm:$0xf0]  ;;  %399 = vmatpush.bf16.msra.mxu2 %v986_v16  ;;  %v1265_v26 = vld [vmem:[#allocation8 + $0x64] sm:$0xf0] }
  0x23   :  { %v1054_v25 = vor.u32 %v1282_v22, %v1051_v23  ;;  %v1041_v27 = vld [vmem:[#allocation8 + $0xe0] sm:$0xf]  ;;  %v1281_v28 = vld [vmem:[#allocation8 + $0xe4] sm:$0xf0]  ;;  %174 = vmatpush.bf16.msra.mxu0 %v912_v10  ;;  %v978_v29 = vor.u32 %v1265_v26, %v977_v24  ;;  %v1264_v31 = vld [vmem:[#allocation8 + $0x64] sm:$0xf] }
  0x24   :  { %413 = vmatpush.bf16.msra.mxu3 %v1050_v20  ;;  %v1042_v30 = vor.u32 %v1281_v28, %v1041_v27  ;;  %v979_v32 = vld [vmem:[#allocation8 + $0x68] sm:$0xf0]  ;;  %v1280_v33 = vld [vmem:[#allocation8 + $0xe4] sm:$0xf]  ;;  %188 = vmatpush.bf16.msra.mxu1 %v916_v14  ;;  %v969_v36 = vld [vmem:[#allocation8 + $0x50] sm:$0xf] }
  0x25   :  { %v982_v34 = vor.u32 %v1264_v31, %v979_v32  ;;  %v1043_v35 = vld [vmem:[#allocation8 + $0xe8] sm:$0xf0]  ;;  %v1263_v37 = vld [vmem:[#allocation8 + $0x54] sm:$0xf0]  ;;  %v1033_v39 = vld [vmem:[#allocation8 + $0xd0] sm:$0xf] }
  0x26   :  { %v1046_v38 = vor.u32 %v1280_v33, %v1043_v35  ;;  %v1279_v40 = vld [vmem:[#allocation8 + $0xd4] sm:$0xf0]  ;;  %v1262_v41 = vld [vmem:[#allocation8 + $0x54] sm:$0xf]  ;;  %925 = vmatmul.msk.bf16.vlgmr.msra.gmra.mxu0 %vm163_vm0, %v1247_v15  ;;  %400 = vmatpush.bf16.msra.mxu2 %v978_v29  ;;  %v970_v42 = vor.u32 %v1263_v37, %v969_v36  ;;  %v971_v43 = vld [vmem:[#allocation8 + $0x58] sm:$0xf0] }
  0x27   :  { %427 = vmatpush.bf16.msrb.mxu0 %v990_v21  ;;  %v1278_v44 = vld [vmem:[#allocation8 + $0xd4] sm:$0xf]  ;;  %v1035_v45 = vld [vmem:[#allocation8 + $0xd8] sm:$0xf0]  ;;  %926 = vmatmul.msk.bf16.vlgmr.msra.gmra.mxu1 %vm163_vm0, %v1247_v15  ;;  %v1034_v46 = vor.u32 %v1279_v40, %v1033_v39  ;;  %v961_v47 = vld [vmem:[#allocation8 + $0x40] sm:$0xf]  ;;  %v974_v49 = vor.u32 %v1262_v41, %v971_v43 }
  0x28   :  { %441 = vmatpush.bf16.msrb.mxu1 %v1054_v25  ;;  %414 = vmatpush.bf16.msra.mxu3 %v1042_v30  ;;  %v1261_v48 = vld [vmem:[#allocation8 + $0x44] sm:$0xf0]  ;;  %v1025_v50 = vld [vmem:[#allocation8 + $0xc0] sm:$0xf]  ;;  %v1038_v52 = vor.u32 %v1278_v44, %v1035_v45  ;;  %v1260_v53 = vld [vmem:[#allocation8 + $0x44] sm:$0xf] }
  0x29   :  { %v1277_v51 = vld [vmem:[#allocation8 + $0xc4] sm:$0xf0]  ;;  %v963_v54 = vld [vmem:[#allocation8 + $0x48] sm:$0xf0]  ;;  %v962_v55 = vor.u32 %v1261_v48, %v961_v47  ;;  %v1276_v56 = vld [vmem:[#allocation8 + $0xc4] sm:$0xf] }
  0x2a   :  { %401 = vmatpush.bf16.msra.mxu2 %v970_v42  ;;  %v1027_v57 = vld [vmem:[#allocation8 + $0xc8] sm:$0xf0]  ;;  %v1026_v58 = vor.u32 %v1277_v51, %v1025_v50  ;;  %v966_v59 = vor.u32 %v1260_v53, %v963_v54  ;;  %v953_v61 = vld [vmem:[#allocation8 + $0x30] sm:$0xf]  ;;  %v1259_v62 = vld [vmem:[#allocation8 + $0x34] sm:$0xf0] }
  0x2b   :  { %428 = vmatpush.bf16.msrb.mxu0 %v982_v34  ;;  %v1030_v60 = vor.u32 %v1276_v56, %v1027_v57  ;;  %v1017_v63 = vld [vmem:[#allocation8 + $0xb0] sm:$0xf]  ;;  %v954_v0 = vor.u32 %v1259_v62, %v953_v61  ;;  %v1275_v1 = vld [vmem:[#allocation8 + $0xb4] sm:$0xf0]  ;;  %v1258_v2 = vld [vmem:[#allocation8 + $0x34] sm:$0xf] }
  0x2c   :  { %442 = vmatpush.bf16.msrb.mxu1 %v1046_v38  ;;  %415 = vmatpush.bf16.msra.mxu3 %v1034_v46  ;;  %v955_v3 = vld [vmem:[#allocation8 + $0x38] sm:$0xf0]  ;;  %v1018_v4 = vor.u32 %v1275_v1, %v1017_v63  ;;  %v1274_v6 = vld [vmem:[#allocation8 + $0xb4] sm:$0xf]  ;;  %v945_v9 = vld [vmem:[#allocation8 + $0x20] sm:$0xf] }
  0x2d   :  { %v958_v5 = vor.u32 %v1258_v2, %v955_v3  ;;  %v1019_v7 = vld [vmem:[#allocation8 + $0xb8] sm:$0xf0]  ;;  %v1257_v10 = vld [vmem:[#allocation8 + $0x24] sm:$0xf0]  ;;  %v1009_v12 = vld [vmem:[#allocation8 + $0xa0] sm:$0xf] }
  0x2e   :  { %402 = vmatpush.bf16.msra.mxu2 %v962_v55  ;;  %v1022_v8 = vor.u32 %v1274_v6, %v1019_v7  ;;  %v946_v11 = vor.u32 %v1257_v10, %v945_v9  ;;  %v1273_v13 = vld [vmem:[#allocation8 + $0xa4] sm:$0xf0]  ;;  %v1256_v14 = vld [vmem:[#allocation8 + $0x24] sm:$0xf]  ;;  %v947_v16 = vld [vmem:[#allocation8 + $0x28] sm:$0xf0] }
  0x2f   :  { %429 = vmatpush.bf16.msrb.mxu0 %v974_v49  ;;  %v1010_v15 = vor.u32 %v1273_v13, %v1009_v12  ;;  %v1272_v17 = vld [vmem:[#allocation8 + $0xa4] sm:$0xf]  ;;  %v1011_v18 = vld [vmem:[#allocation8 + $0xa8] sm:$0xf0]  ;;  %v950_v19 = vor.u32 %v1256_v14, %v947_v16  ;;  %v937_v21 = vld [vmem:[#allocation8 + $0x10] sm:$0xf] }
  0x30   :  { %443 = vmatpush.bf16.msrb.mxu1 %v1038_v52  ;;  %416 = vmatpush.bf16.msra.mxu3 %v1026_v58  ;;  %v1014_v20 = vor.u32 %v1272_v17, %v1011_v18  ;;  %v1255_v22 = vld [vmem:[#allocation8 + $0x14] sm:$0xf0]  ;;  %v1001_v23 = vld [vmem:[#allocation8 + $0x90] sm:$0xf]  ;;  %v1254_v26 = vld [vmem:[#allocation8 + $0x14] sm:$0xf] }
  0x31   :  { %v938_v24 = vor.u32 %v1255_v22, %v937_v21  ;;  %v1271_v25 = vld [vmem:[#allocation8 + $0x94] sm:$0xf0]  ;;  %v939_v27 = vld [vmem:[#allocation8 + $0x18] sm:$0xf0]  ;;  %v1270_v30 = vld [vmem:[#allocation8 + $0x94] sm:$0xf] }
  0x32   :  { %403 = vmatpush.bf16.msra.mxu2 %v954_v0  ;;  %v1002_v28 = vor.u32 %v1271_v25, %v1001_v23  ;;  %v942_v29 = vor.u32 %v1254_v26, %v939_v27  ;;  %v1003_v31 = vld [vmem:[#allocation8 + $0x98] sm:$0xf0]  ;;  %v929_v33 = vld [vmem:[#allocation8] sm:$0xf]  ;;  %v1253_v34 = vld [vmem:[#allocation8 + $0x4] sm:$0xf0] }
  0x33   :  { %430 = vmatpush.bf16.msrb.mxu0 %v966_v59  ;;  %v1006_v32 = vor.u32 %v1270_v30, %v1003_v31  ;;  %v993_v35 = vld [vmem:[#allocation8 + $0x80] sm:$0xf]  ;;  %v930_v36 = vor.u32 %v1253_v34, %v929_v33  ;;  %v1269_v37 = vld [vmem:[#allocation8 + $0x84] sm:$0xf0]  ;;  %v1252_v38 = vld [vmem:[#allocation8 + $0x4] sm:$0xf] }
  0x34   :  { %444 = vmatpush.bf16.msrb.mxu1 %v1030_v60  ;;  %417 = vmatpush.bf16.msra.mxu3 %v1018_v4  ;;  %v931_v39 = vld [vmem:[#allocation8 + $0x8] sm:$0xf0]  ;;  %v994_v40 = vor.u32 %v1269_v37, %v993_v35  ;;  %v1268_v42 = vld [vmem:[#allocation8 + $0x84] sm:$0xf]  ;;  %v1177_v45 = vld [vmem:[#allocation10 + $0xf0] sm:$0xf] }
  0x35   :  { %v934_v41 = vor.u32 %v1252_v38, %v931_v39  ;;  %v995_v43 = vld [vmem:[#allocation8 + $0x88] sm:$0xf0]  ;;  %v1315_v46 = vld [vmem:[#allocation10 + $0xf4] sm:$0xf0]  ;;  %v1314_v47 = vld [vmem:[#allocation10 + $0xf4] sm:$0xf] }
  0x36   :  { %404 = vmatpush.bf16.msra.mxu2 %v946_v11  ;;  %v998_v44 = vor.u32 %v1268_v42, %v995_v43  ;;  %v1178_v48 = vor.u32 %v1315_v46, %v1177_v45  ;;  %v1179_v49 = vld [vmem:[#allocation10 + $0xf8] sm:$0xf0]  ;;  %v1169_v50 = vld [vmem:[#allocation10 + $0xe0] sm:$0xf]  ;;  %v1313_v51 = vld [vmem:[#allocation10 + $0xe4] sm:$0xf0] }
  0x37   :  { %431 = vmatpush.bf16.msrb.mxu0 %v958_v5  ;;  %v1182_v52 = vor.u32 %v1314_v47, %v1179_v49  ;;  %v1312_v53 = vld [vmem:[#allocation10 + $0xe4] sm:$0xf]  ;;  %v1171_v54 = vld [vmem:[#allocation10 + $0xe8] sm:$0xf0]  ;;  %v1113_v55 = vld [vmem:[#allocation10 + $0x70] sm:$0xf]  ;;  %v1170_v56 = vor.u32 %v1313_v51, %v1169_v50 }
  0x38   :  { %445 = vmatpush.bf16.msrb.mxu1 %v1022_v8  ;;  %418 = vmatpush.bf16.msra.mxu3 %v1010_v15  ;;  %v1299_v57 = vld [vmem:[#allocation10 + $0x74] sm:$0xf0]  ;;  %v1298_v58 = vld [vmem:[#allocation10 + $0x74] sm:$0xf]  ;;  %v1115_v59 = vld [vmem:[#allocation10 + $0x78] sm:$0xf0]  ;;  %v1174_v60 = vor.u32 %v1312_v53, %v1171_v54 }
  0x39   :  { %v1114_v61 = vor.u32 %v1299_v57, %v1113_v55  ;;  %v1118_v62 = vor.u32 %v1298_v58, %v1115_v59  ;;  %v1161_v63 = vld [vmem:[#allocation10 + $0xd0] sm:$0xf]  ;;  %v1311_v0 = vld [vmem:[#allocation10 + $0xd4] sm:$0xf0]  ;;  %v1310_v1 = vld [vmem:[#allocation10 + $0xd4] sm:$0xf] }
  0x3a   :  { %405 = vmatpush.bf16.msra.mxu2 %v938_v24  ;;  %v1163_v2 = vld [vmem:[#allocation10 + $0xd8] sm:$0xf0]  ;;  %v1105_v3 = vld [vmem:[#allocation10 + $0x60] sm:$0xf]  ;;  %v1297_v4 = vld [vmem:[#allocation10 + $0x64] sm:$0xf0]  ;;  %v1162_v8 = vor.u32 %v1311_v0, %v1161_v63 }
  0x3b   :  { %432 = vmatpush.bf16.msrb.mxu0 %v950_v19  ;;  %v1106_v5 = vor.u32 %v1297_v4, %v1105_v3  ;;  %v1296_v6 = vld [vmem:[#allocation10 + $0x64] sm:$0xf]  ;;  %v1107_v7 = vld [vmem:[#allocation10 + $0x68] sm:$0xf0]  ;;  %v1166_v10 = vor.u32 %v1310_v1, %v1163_v2  ;;  %v1153_v11 = vld [vmem:[#allocation10 + $0xc0] sm:$0xf] }
  0x3c   :  { %446 = vmatpush.bf16.msrb.mxu1 %v1014_v20  ;;  %419 = vmatpush.bf16.msra.mxu3 %v1002_v28  ;;  %v1110_v9 = vor.u32 %v1296_v6, %v1107_v7  ;;  %v1309_v12 = vld [vmem:[#allocation10 + $0xc4] sm:$0xf0]  ;;  %v1308_v13 = vld [vmem:[#allocation10 + $0xc4] sm:$0xf]  ;;  %v1155_v14 = vld [vmem:[#allocation10 + $0xc8] sm:$0xf0] }
  0x3d   :  { %v1154_v15 = vor.u32 %v1309_v12, %v1153_v11  ;;  %v1158_v16 = vor.u32 %v1308_v13, %v1155_v14  ;;  %v132_v17 = vld [vmem:[#allocation7] sm:$0x3]  ;;  %v1097_v34 = vld [vmem:[#allocation10 + $0x50] sm:$0xf]  ;;  %v1295_v35 = vld [vmem:[#allocation10 + $0x54] sm:$0xf0] }
  0x3e   :  { %406 = vmatpush.bf16.msra.mxu2 %v930_v36  ;;  %v134_v20 = vperm.slane %v132_v17, 0  ;;  %v135_v21 = vperm.slane %v132_v17, 1  ;;  %v1294_v36 = vld [vmem:[#allocation10 + $0x54] sm:$0xf]  ;;  %v1098_v37 = vor.u32 %v1295_v35, %v1097_v34  ;;  %v1099_v38 = vld [vmem:[#allocation10 + $0x58] sm:$0xf0] }
  0x3f   :  { %433 = vmatpush.bf16.msrb.mxu0 %v942_v29  ;;  %v1102_v39 = vor.u32 %v1294_v36, %v1099_v38  ;;  %v1306_v42 = vld [vmem:[#allocation10 + $0xb4] sm:$0xf]  ;;  %v1089_v46 = vld [vmem:[#allocation10 + $0x40] sm:$0xf]  ;;  %v1293_v47 = vld [vmem:[#allocation10 + $0x44] sm:$0xf0] }
  0x40   :  { %447 = vmatpush.bf16.msrb.mxu1 %v1006_v32  ;;  %420 = vmatpush.bf16.msra.mxu3 %v994_v40  ;;  %v1145_v40 = vld [vmem:[#allocation10 + $0xb0] sm:$0xf]  ;;  %v1090_v49 = vor.u32 %v1293_v47, %v1089_v46  ;;  %v1091_v50 = vld [vmem:[#allocation10 + $0x48] sm:$0xf0]  ;;  %v1305_v53 = vld [vmem:[#allocation10 + $0xa4] sm:$0xf0] }
  0x41   :  { %v1304_v54 = vld [vmem:[#allocation10 + $0xa4] sm:$0xf]  ;;  %v1081_v58 = vld [vmem:[#allocation10 + $0x30] sm:$0xf]  ;;  %v1291_v59 = vld [vmem:[#allocation10 + $0x34] sm:$0xf0] }
  0x42   :  { %659 = vmatpush.bf16.msrb.mxu2 %v1114_v61  ;;  %v1082_v61 = vor.u32 %v1291_v59, %v1081_v58  ;;  %v1129_v0 = vld [vmem:[#allocation10 + $0x90] sm:$0xf]  ;;  %v1303_v1 = vld [vmem:[#allocation10 + $0x94] sm:$0xf0]  ;;  %v1302_v2 = vld [vmem:[#allocation10 + $0x94] sm:$0xf] }
  0x43   :  { %434 = vmatpush.bf16.msrb.mxu0 %v934_v41  ;;  %v1307_v41 = vld [vmem:[#allocation10 + $0xb4] sm:$0xf0]  ;;  %v1130_v3 = vor.u32 %v1303_v1, %v1129_v0  ;;  %v1131_v4 = vld [vmem:[#allocation10 + $0x98] sm:$0xf0]  ;;  %v1073_v6 = vld [vmem:[#allocation10 + $0x20] sm:$0xf] }
  0x44   :  { %448 = vmatpush.bf16.msrb.mxu1 %v998_v44  ;;  %673 = vmatpush.bf16.msrb.mxu3 %v1178_v48  ;;  %v1146_v43 = vor.u32 %v1307_v41, %v1145_v40  ;;  %v1147_v44 = vld [vmem:[#allocation10 + $0xb8] sm:$0xf0]  ;;  %v1292_v48 = vld [vmem:[#allocation10 + $0x44] sm:$0xf]  ;;  %v1289_v7 = vld [vmem:[#allocation10 + $0x24] sm:$0xf0] }
  0x45   :  { %v1150_v45 = vor.u32 %v1306_v42, %v1147_v44  ;;  %v1094_v51 = vor.u32 %v1292_v48, %v1091_v50  ;;  %v1121_v12 = vld [vmem:[#allocation10 + $0x80] sm:$0xf]  ;;  %v1301_v13 = vld [vmem:[#allocation10 + $0x84] sm:$0xf0]  ;;  %v1300_v14 = vld [vmem:[#allocation10 + $0x84] sm:$0xf] }
  0x46   :  { %660 = vmatpush.bf16.msrb.mxu2 %v1106_v5  ;;  %v1134_v5 = vor.u32 %v1302_v2, %v1131_v4  ;;  %v1329_v58 = vld [vmem:[#allocation11 + $0x68] sm:$0xff]  ;;  %v1322_v59 = vld [vmem:[#allocation11 + $0x30] sm:$0xff]  ;;  %v1319_v1 = vld [vmem:[#allocation11 + $0x18] sm:$0xff]  ;;  %s889_s24 = sshll.u32 %s1636_s9, 4  ;;  %s890_s24 = int_to_ptr.hbm [resolvable:$true] %s889_s24 }
  0x47   :  { %687 = vmatpush.bf16.msra.mxu0 %v1118_v62  ;;  %v1083_v62 = vld [vmem:[#allocation10 + $0x38] sm:$0xf0]  ;;  %v1326_v0 = vld [vmem:[#allocation11 + $0x50] sm:$0xff]  ;;  %v1325_v2 = vld [vmem:[#allocation11 + $0x48] sm:$0xff] }
  0x48   :  { %701 = vmatpush.bf16.msra.mxu1 %v1182_v52  ;;  %674 = vmatpush.bf16.msrb.mxu3 %v1170_v56  ;;  %v1137_v52 = vld [vmem:[#allocation10 + $0xa0] sm:$0xf]  ;;  %v1139_v56 = vld [vmem:[#allocation10 + $0xa8] sm:$0xf0] }
  0x49   :  { %v1138_v55 = vor.u32 %v1305_v53, %v1137_v52  ;;  %v1142_v57 = vor.u32 %v1304_v54, %v1139_v56  ;;  %v1324_v4 = vld [vmem:[#allocation11 + $0x40] sm:$0xff] }
  0x4a   :  { %661 = vmatpush.bf16.msrb.mxu2 %v1098_v37 }
  0x4b   :  { %688 = vmatpush.bf16.msra.mxu0 %v1110_v9  ;;  %v1074_v9 = vor.u32 %v1289_v7, %v1073_v6  ;;  %v1316_v6 = vld [vmem:[#allocation11] sm:$0xff]  ;;  %v493_v7 = vld [vmem:[%s1633_s6] sm:$0x3] }
  0x4c   :  { %702 = vmatpush.bf16.msra.mxu1 %v1174_v60  ;;  %675 = vmatpush.bf16.msrb.mxu3 %v1162_v8  ;;  %v1290_v60 = vld [vmem:[#allocation10 + $0x34] sm:$0xf]  ;;  %v1288_v8 = vld [vmem:[#allocation10 + $0x24] sm:$0xf] }
  0x4d   :  { %v1086_v63 = vor.u32 %v1290_v60, %v1083_v62  ;;  %v1328_v60 = vld [vmem:[#allocation11 + $0x60] sm:$0xff]  ;;  %v1327_v62 = vld [vmem:[#allocation11 + $0x58] sm:$0xff] }
  0x4e   :  { %662 = vmatpush.bf16.msrb.mxu2 %v1090_v49 }
  0x4f   :  { %689 = vmatpush.bf16.msra.mxu0 %v1102_v39 }
  0x50   :  { %703 = vmatpush.bf16.msra.mxu1 %v1166_v10  ;;  %676 = vmatpush.bf16.msrb.mxu3 %v1154_v15  ;;  %v1075_v10 = vld [vmem:[#allocation10 + $0x28] sm:$0xf0]  ;;  %v1122_v15 = vor.u32 %v1301_v13, %v1121_v12 }
  0x51   :  { %v1078_v11 = vor.u32 %v1288_v8, %v1075_v10  ;;  %v496_v10 = vperm.slane %v493_v7, 1 }
  0x52   :  { %663 = vmatpush.bf16.msrb.mxu2 %v1082_v61  ;;  %v1321_v61 = vld [vmem:[#allocation11 + $0x28] sm:$0xff] }
  0x53   :  { %690 = vmatpush.bf16.msra.mxu0 %v1094_v51 }
  0x54   :  { %704 = vmatpush.bf16.msra.mxu1 %v1158_v16  ;;  %677 = vmatpush.bf16.msrb.mxu3 %v1146_v43  ;;  %v1123_v16 = vld [vmem:[#allocation10 + $0x88] sm:$0xf0] }
  0x55   :  { %v1126_v17 = vor.u32 %v1300_v14, %v1123_v16  ;;  %v495_v14 = vperm.slane %v493_v7, 0 }
  0x56   :  { %664 = vmatpush.bf16.msrb.mxu2 %v1074_v9 }
  0x57   :  { %691 = vmatpush.bf16.msra.mxu0 %v1086_v63  ;;  %v1320_v63 = vld [vmem:[#allocation11 + $0x20] sm:$0xff] }
  0x58   :  { %705 = vmatpush.bf16.msra.mxu1 %v1150_v45  ;;  %678 = vmatpush.bf16.msrb.mxu3 %v1138_v55 }
  0x5b   :  { %692 = vmatpush.bf16.msra.mxu0 %v1078_v11 }
  0x5c   :  { %706 = vmatpush.bf16.msra.mxu1 %v1142_v57  ;;  %679 = vmatpush.bf16.msrb.mxu3 %v1130_v3  ;;  %v1318_v3 = vld [vmem:[#allocation11 + $0x10] sm:$0xff] }
  0x60   :  { %707 = vmatpush.bf16.msra.mxu1 %v1134_v5  ;;  %680 = vmatpush.bf16.msrb.mxu3 %v1122_v15  ;;  %v1317_v5 = vld [vmem:[#allocation11 + $0x8] sm:$0xff] }
  0x64   :  { %708 = vmatpush.bf16.msra.mxu1 %v1126_v17 }
  0xa3   :  { %v176_v18 = vpop.f32.mrf.mxu0 }
  0xa4   :  { %v190_v19 = vpop.f32.mrf.mxu1  ;;  %v177_v22 = vadd.f32 %v176_v18, %v134_v20  ;;  %v1065_v18 = vld [vmem:[#allocation10 + $0x10] sm:$0xf] }
  0xa5   :  { %v191_v23 = vadd.f32 %v190_v19, %v135_v21  ;;  %v1287_v19 = vld [vmem:[#allocation10 + $0x14] sm:$0xf0] }
  0xa6   :  { %v195_v28 = vmax.f32 %v177_v22, 0.0  ;;  %v1067_v22 = vld [vmem:[#allocation10 + $0x18] sm:$0xf0] }
  0xa7   :  { %v196_v30 = vmax.f32 %v191_v23, 0.0 }
  0xab   :  { %v178_v24 = vpop.f32.mrf.mxu0 }
  0xac   :  { %v179_v25 = vadd.f32 %v178_v24, %v134_v20  ;;  %v192_v26 = vpop.f32.mrf.mxu1  ;;  %v1286_v20 = vld [vmem:[#allocation10 + $0x14] sm:$0xf]  ;;  %v1057_v24 = vld [vmem:[#allocation10] sm:$0xf] }
  0xad   :  { %v193_v27 = vadd.f32 %v192_v26, %v135_v21  ;;  %v1066_v21 = vor.u32 %v1287_v19, %v1065_v18  ;;  %v1070_v23 = vor.u32 %v1286_v20, %v1067_v22  ;;  %v1284_v26 = vld [vmem:[#allocation10 + $0x4] sm:$0xf] }
  0xae   :  { %v197_v29 = vmax.f32 %v179_v25, 0.0  ;;  %v1285_v25 = vld [vmem:[#allocation10 + $0x4] sm:$0xf0] }
  0xaf   :  { %v198_v31 = vmax.f32 %v193_v27, 0.0  ;;  %665 = vmatpush.bf16.msrb.mxu2 %v1066_v21  ;;  %693 = vmatpush.bf16.msra.mxu0 %v1070_v23  ;;  %v1058_v27 = vor.u32 %v1285_v25, %v1057_v24 }
  0xb0   :  { %v199_v32 = vpack.c.bf16 %v197_v29, %v195_v28  ;;  %v1059_v28 = vld [vmem:[#allocation10 + $0x8] sm:$0xf0] }
  0xb1   :  { %v200_v33 = vpack.c.bf16 %v198_v31, %v196_v30  ;;  %v1062_v29 = vor.u32 %v1284_v26, %v1059_v28  ;;  %v1331_v30 = vld [vmem:[#allocation11 + $0x78] sm:$0xff] }
  0xb2   :  { %407 = vmatmul.bf16.vlgmr.msra.gmra.mxu2 %v199_v32  ;;  %435 = vmatmul.bf16.vlgmr.msrb.gmra.mxu0 %v199_v32  ;;  %v1323_v31 = vld [vmem:[#allocation11 + $0x38] sm:$0xff]  ;;  %v1330_v32 = vld [vmem:[#allocation11 + $0x70] sm:$0xff] }
  0xb3   :  { %421 = vmatmul.bf16.vlgmr.msra.gmra.mxu3 %v200_v33  ;;  %449 = vmatmul.bf16.vlgmr.msrb.gmra.mxu1 %v200_v33  ;;  %v233_v33 = vld [vmem:[%s1631_s4] sm:$0x3] }
  0xb4   :  { %666 = vmatpush.bf16.msrb.mxu2 %v1058_v27  ;;  %694 = vmatpush.bf16.msra.mxu0 %v1062_v29  ;;  %v236_v35 = vperm.slane %v233_v33, 1  ;;  %v235_v39 = vperm.slane %v233_v33, 0 }
  0xb5   :  { %867 = vmatpush.bf16.msra.mxu3 %v1331_v30 }
  0xb8   :  { %853 = vmatpush.bf16.msra.mxu2 %v1323_v31 }
  0xb9   :  { %868 = vmatpush.bf16.msra.mxu3 %v1330_v32  ;;  %v1343_v32 = vld [vmem:[%s1635_s8] ss:$0 sm:$0xff] }
  0xbc   :  { %854 = vmatpush.bf16.msra.mxu2 %v1322_v59 }
  0xbd   :  { %869 = vmatpush.bf16.msra.mxu3 %v1329_v58 }
  0xc0   :  { %855 = vmatpush.bf16.msra.mxu2 %v1321_v61 }
  0xc1   :  { %870 = vmatpush.bf16.msra.mxu3 %v1328_v60 }
  0xc4   :  { %856 = vmatpush.bf16.msra.mxu2 %v1320_v63 }
  0xc5   :  { %871 = vmatpush.bf16.msra.mxu3 %v1327_v62 }
  0xc8   :  { %857 = vmatpush.bf16.msra.mxu2 %v1319_v1 }
  0xc9   :  { %872 = vmatpush.bf16.msra.mxu3 %v1326_v0 }
  0xcc   :  { %858 = vmatpush.bf16.msra.mxu2 %v1318_v3 }
  0xcd   :  { %873 = vmatpush.bf16.msra.mxu3 %v1325_v2 }
  0xd0   :  { %859 = vmatpush.bf16.msra.mxu2 %v1317_v5 }
  0xd1   :  { %874 = vmatpush.bf16.msra.mxu3 %v1324_v4 }
  0xd4   :  { %860 = vmatpush.bf16.msra.mxu2 %v1316_v6 }
 0x12f   :  { %v436_v34 = vpop.f32.mrf.mxu0 }
 0x130   :  { %v450_v36 = vpop.f32.mrf.mxu1  ;;  %v437_v37 = vadd.f32 %v436_v34, %v236_v35 }
 0x132   :  { %v451_v42 = vadd.f32 %v450_v36, %v437_v37 }
 0x134   :  { %v456_v47 = vmax.f32 %v451_v42, 0.0 }
 0x135   :  { %v408_v38 = vpop.f32.mrf.mxu2 }
 0x136   :  { %v422_v40 = vpop.f32.mrf.mxu3  ;;  %v409_v45 = vadd.f32 %v408_v38, %v235_v39 }
 0x137   :  { %v438_v41 = vpop.f32.mrf.mxu0 }
 0x138   :  { %v439_v43 = vadd.f32 %v438_v41, %v236_v35  ;;  %v452_v44 = vpop.f32.mrf.mxu1  ;;  %v423_v50 = vadd.f32 %v422_v40, %v409_v45 }
 0x13a   :  { %v453_v46 = vadd.f32 %v452_v44, %v439_v43  ;;  %v455_v55 = vmax.f32 %v423_v50, 0.0 }
 0x13c   :  { %v458_v48 = vmax.f32 %v453_v46, 0.0 }
 0x13d   :  { %v410_v49 = vpop.f32.mrf.mxu2 }
 0x13e   :  { %v460_v51 = vpack.c.bf16 %v458_v48, %v456_v47  ;;  %v411_v52 = vadd.f32 %v410_v49, %v235_v39  ;;  %v424_v53 = vpop.f32.mrf.mxu3 }
 0x140   :  { %v425_v54 = vadd.f32 %v424_v53, %v411_v52  ;;  %681 = vmatmul.bf16.vlgmr.msrb.gmra.mxu3 %v460_v51  ;;  %709 = vmatmul.bf16.vlgmr.msra.gmra.mxu1 %v460_v51 }
 0x142   :  { %v457_v56 = vmax.f32 %v425_v54, 0.0 }
 0x144   :  { %v459_v57 = vpack.c.bf16 %v457_v56, %v455_v55 }
 0x146   :  { %667 = vmatmul.bf16.vlgmr.msrb.gmra.mxu2 %v459_v57  ;;  %695 = vmatmul.bf16.vlgmr.msra.gmra.mxu0 %v459_v57 }
 0x1bd   :  { %v710_v8 = vpop.f32.mrf.mxu1 }
 0x1c3   :  { %v696_v9 = vpop.f32.mrf.mxu0  ;;  %v682_v12 = vpop.f32.mrf.mxu3 }
 0x1c4   :  { %v697_v11 = vadd.f32 %v696_v9, %v496_v10 }
 0x1c5   :  { %v712_v18 = vpop.f32.mrf.mxu1 }
 0x1c6   :  { %v711_v16 = vadd.f32 %v710_v8, %v697_v11 }
 0x1c8   :  { %v716_v21 = vmax.f32 %v711_v16, 0.0 }
 0x1c9   :  { %v668_v13 = vpop.f32.mrf.mxu2 }
 0x1ca   :  { %v669_v19 = vadd.f32 %v668_v13, %v495_v14 }
 0x1cb   :  { %v698_v15 = vpop.f32.mrf.mxu0  ;;  %v684_v27 = vpop.f32.mrf.mxu3 }
 0x1cc   :  { %v699_v17 = vadd.f32 %v698_v15, %v496_v10  ;;  %v683_v24 = vadd.f32 %v682_v12, %v669_v19 }
 0x1ce   :  { %v713_v20 = vadd.f32 %v712_v18, %v699_v17  ;;  %v715_v29 = vmax.f32 %v683_v24, 0.0 }
 0x1d0   :  { %v718_v22 = vmax.f32 %v713_v20, 0.0 }
 0x1d1   :  { %v670_v23 = vpop.f32.mrf.mxu2 }
 0x1d2   :  { %v720_v25 = vpack.c.bf16 %v718_v22, %v716_v21  ;;  %v671_v26 = vadd.f32 %v670_v23, %v495_v14 }
 0x1d4   :  { %v685_v28 = vadd.f32 %v684_v27, %v671_v26  ;;  %875 = vmatmul.bf16.vlgmr.msra.gmra.mxu3 %v720_v25 }
 0x1d6   :  { %v717_v30 = vmax.f32 %v685_v28, 0.0 }
 0x1d8   :  { %v719_v31 = vpack.c.bf16 %v717_v30, %v715_v29 }
 0x1da   :  { %861 = vmatmul.bf16.vlgmr.msra.gmra.mxu2 %v719_v31 }
 0x257   :  { %v876_v33 = vpop.f32.mrf.mxu3 }
 0x25d   :  { %v862_v34 = vpop.f32.mrf.mxu2 }
 0x25e   :  { %v863_v35 = vadd.f32 %v1343_v32, %v862_v34 }
 0x25f   :  { %v878_v39 = vpop.f32.mrf.mxu3 }
 0x260   :  { %v877_v36 = vadd.f32 %v876_v33, %v863_v35 }
 0x262   :  { %881 = vst [vmem:[#allocation13] sm:$0xff] %v877_v36 }
 0x265   :  { %v864_v37 = vpop.f32.mrf.mxu2 }
 0x266   :  { %v865_v38 = vadd.f32 %v1343_v32, %v864_v37 }
 0x268   :  { %v879_v40 = vadd.f32 %v878_v39, %v865_v38 }
 0x26a   :  { %882 = vst [vmem:[#allocation13 + $0x8] sm:$0xff] %v879_v40 }
 0x26b   :  { %895 = dma.vmem_to_hbm [thread:$0]  %s888_s22, 256, %s890_s24, [#allocation4], %s1523_s17, %s1523_s17, %s1524_s18  }
 0x26c   :  { %1520 = dma.done.wait [#allocation4], 256  }
 0x26d   :  { %1521 = vsyncadd [#allocation4], 4294967040 }
 0x26e   :  { %900 = vsyncpa [#allocation3], 1 }
 0x26f   :  { %901 = vsyncpa [#allocation6], 1 }
 0x270   :  { %902 = vsyncpa [#allocation9], 1 }
 0x271   :  { %903 = vsyncpa [#allocation12], 1 }
 0x272   :  { %904 = vsyncpa [#allocation4], 1 }

</bundles_post_ra>
